<compile_context>
chip_gen: v7x
topology: tpu7x:2x2x1
jax: 0.10.0
libtpu: 0.0.40
codegen_flags: <defaults>
</compile_context>

<pallas_src>
import functools

import jax
import jax.numpy as jnp
import numpy as np
from jax.experimental import pallas as pl
from jax.experimental.pallas import tpu as pltpu


def _cdiv(a, b):
    return -(-a // b)


def _round_up(a, b):
    return _cdiv(a, b) * b


@functools.lru_cache(maxsize=1)
def _num_tensorcores():
    """2 on megacore / v7x-style chips, 1 on single-TensorCore chips (v5e/v6e)."""
    try:
        dev = jax.devices()[0]
        if dev.platform != "tpu":
            return 1
        kind = dev.device_kind.lower()
    except Exception:  # pragma: no cover - defensive
        return 1
    single_tc = ("v2", "v3", "v5 lite", "v5lite", "v5e", "v6 lite", "v6lite",
                 "v6e", "v6")
    if any(tag in kind for tag in single_tc):
        return 1
    return 2  # v4 / v5p megacore, v7x (2 TCs). Correct either way; perf only.


# ----------------------------------------------------------------------------
# Pallas kernel: per-dataset summed soft-CE loss (and optionally summed
# accuracy) partials per core. Grid = (core, batch_tile); the batch axis is the
# reduction axis ("arbitrary"), the core axis is "parallel".
# ----------------------------------------------------------------------------
def _loss_kernel(logits_ref, targets_ref, loss_ref, acc_ref=None, *,
                 num_datasets, c_pad, true_b, mask_tail, compute_acc):
    t_idx = pl.program_id(1)

    @pl.when(t_idx == 0)
    def _():
        loss_ref[...] = jnp.zeros_like(loss_ref)
        if compute_acc:
            acc_ref[...] = jnp.zeros_like(acc_ref)

    tb = logits_ref.shape[0]

    # Row-validity mask only needed for the accuracy path on a padded batch
    # (zero-padded rows contribute exactly 0 loss, so no mask there).
    valid = None
    if compute_acc and mask_tail:
        base = (pl.program_id(0) * pl.num_programs(1) + t_idx) * tb
        row = base + jax.lax.broadcasted_iota(jnp.int32, (tb, 1), 0)
        valid = (row < true_b).astype(jnp.float32)              # (tb, 1)

    loss_cols = []
    acc_cols = []
    for s in range(num_datasets):                               # static loop
        lo = s * c_pad                                          # lane-aligned
        xs = logits_ref[:, lo:lo + c_pad].astype(jnp.float32)   # (tb, c_pad)
        ts = targets_ref[:, lo:lo + c_pad].astype(jnp.float32)  # (tb, c_pad)

        # soft CE: -sum(t * log_softmax(x)) = (m + lse) * sum(t) - sum(t * x)
        m = jnp.max(xs, axis=-1, keepdims=True)                 # (tb, 1)
        lse = jnp.log(jnp.sum(jnp.exp(xs - m), axis=-1, keepdims=True))
        t_sum = jnp.sum(ts, axis=-1, keepdims=True)
        tx = jnp.sum(ts * xs, axis=-1, keepdims=True)
        col = (m + lse) * t_sum - tx                            # (tb, 1)
        # Layout-preserving sublane fold (tb,1) -> (8,1) partial.
        loss_cols.append(col.reshape(tb // 8, 8, 1).sum(axis=0))

        if compute_acc:
            # first-argmax(logits) == first-argmax(targets); reuse m.
            iota = jax.lax.broadcasted_iota(jnp.int32, (tb, c_pad), 1)
            x_arg = jnp.min(jnp.where(xs == m, iota, c_pad),
                            axis=-1, keepdims=True)
            t_max = jnp.max(ts, axis=-1, keepdims=True)
            t_arg = jnp.min(jnp.where(ts == t_max, iota, c_pad),
                            axis=-1, keepdims=True)
            acc_col = (x_arg == t_arg).astype(jnp.float32)      # (tb, 1)
            if mask_tail:
                acc_col = acc_col * valid
            acc_cols.append(acc_col.reshape(tb // 8, 8, 1).sum(axis=0))

    # Single read-modify-write of the resident (8, S) output block per tile.
    loss_ref[...] += jnp.concatenate(loss_cols, axis=1)
    if compute_acc:
        acc_ref[...] += jnp.concatenate(acc_cols, axis=1)


@functools.partial(jax.jit, static_argnames=("batch_tile", "compute_acc"))
def _mean_losses_accs(logits, targets, batch_tile=1024, compute_acc=False):
    """Returns (mean_losses[S], mean_accs[S] or None) via the Pallas kernel."""
    B, S, C = logits.shape
    nc = _num_tensorcores()

    # Pad classes to a lane multiple only if needed (C % 128 == 0 is the free
    # fast path). Logits pad with the most-negative finite value so it never
    # wins max/lse/argmax; targets pad with 0 so it contributes nothing.
    c_pad = _round_up(C, 128)
    if c_pad != C:
        neg = float(jnp.finfo(logits.dtype).min) if jnp.issubdtype(
            logits.dtype, jnp.floating) else -1e30
        logits = jnp.pad(logits, ((0, 0), (0, 0), (0, c_pad - C)),
                         constant_values=neg)
        targets = jnp.pad(targets, ((0, 0), (0, 0), (0, c_pad - C)))

    # Free trailing-dim collapse: (B, S, c_pad) -> (B, S*c_pad). No sublane
    # padding, fully lane-dense blocks.
    logits = logits.reshape(B, S * c_pad)
    targets = targets.reshape(B, S * c_pad)

    # VMEM budget for the pipelined input blocks: 2 inputs x 2 buffers, keep
    # within 24 MiB so the explicit 32 MiB scoped limit below is safe on every
    # generation (v5e default scoped is only 16 MiB).
    row_bytes = S * c_pad * (jnp.dtype(logits.dtype).itemsize
                             + jnp.dtype(targets.dtype).itemsize)
    vmem_budget = 24 * 1024 * 1024
    tb_vmem = max(8, (vmem_budget // (2 * row_bytes)) // 8 * 8)
    tb = min(batch_tile, tb_vmem, _round_up(_cdiv(B, nc), 8))
    tb = _round_up(max(tb, 8), 8)

    tiles_per_core = _cdiv(B, nc * tb)
    b_pad = nc * tiles_per_core * tb
    if b_pad != B:
        logits = jnp.pad(logits, ((0, b_pad - B), (0, 0)))
        targets = jnp.pad(targets, ((0, b_pad - B), (0, 0)))

    in_spec = pl.BlockSpec((tb, S * c_pad),
                           lambda c, t: (c * tiles_per_core + t, 0))
    out_spec = pl.BlockSpec((8, S), lambda c, t: (c, 0))

    kernel = functools.partial(
        _loss_kernel, num_datasets=S, c_pad=c_pad, true_b=B,
        mask_tail=(b_pad != B), compute_acc=compute_acc)

    out_shapes = [jax.ShapeDtypeStruct((nc * 8, S), jnp.float32)]
    out_specs = [out_spec]
    if compute_acc:
        out_shapes.append(jax.ShapeDtypeStruct((nc * 8, S), jnp.float32))
        out_specs.append(out_spec)

    outs = pl.pallas_call(
        kernel,
        out_shape=tuple(out_shapes),
        grid=(nc, tiles_per_core),
        in_specs=[in_spec, in_spec],
        out_specs=tuple(out_specs),
        compiler_params=pltpu.CompilerParams(
            dimension_semantics=("parallel", "arbitrary"),
            vmem_limit_bytes=32 * 1024 * 1024),
    )(logits, targets)

    inv_b = jnp.float32(1.0 / B)
    mean_losses = outs[0].sum(axis=0) * inv_b
    mean_accs = outs[1].sum(axis=0) * inv_b if compute_acc else None
    return mean_losses, mean_accs


# ----------------------------------------------------------------------------
# Functional equivalent of WeightedExpLoss.forward (buffers handled as state).
# ----------------------------------------------------------------------------
def init_weighted_exp_state(num_datasets, dataset_weights=None):
    if dataset_weights is None:
        dataset_weights = [1.0] * num_datasets
    dw = jnp.asarray(dataset_weights, jnp.float32)
    dw = dw / dw.sum()
    weights = dw
    moving_average = jnp.ones((num_datasets,), jnp.float32) / num_datasets
    return {"moving_average": moving_average,
            "weights": weights,
            "dataset_weights": dw}


def weighted_exp_loss_forward(logits, targets, state,
                              alpha_exp_smooth=0.99,
                              include_clean_samples=False,
                              track_metric="loss"):
    """Matches WeightedExpLoss.forward (track_metric in {'loss','acc'})."""
    # _assert_shape semantics
    if logits.ndim == 2:
        logits = logits[:, None, :]
    if targets.ndim == 2:
        targets = targets[:, None, :]
    assert logits.ndim == 3 and targets.ndim == 3
    assert logits.shape == targets.shape

    # The accuracy computation is compiled out of the kernel when it is unused.
    compute_acc = (track_metric == "acc")
    mean_losses, mean_accs = _mean_losses_accs(logits, targets,
                                               compute_acc=compute_acc)

    # PyTorch: ma *= (1 - alpha); ma += alpha * metric.detach()
    ma = state["moving_average"] * (1.0 - alpha_exp_smooth)
    if track_metric == "loss":
        ma = ma + alpha_exp_smooth * jax.lax.stop_gradient(mean_losses)
    else:
        ma = ma + alpha_exp_smooth * (1.0 - jax.lax.stop_gradient(mean_accs))

    dw = state["dataset_weights"]
    if include_clean_samples:
        w = ma * dw
        w = w / w.sum()
    else:
        non_clean = ma[1:] * dw[1:]
        non_clean = non_clean / non_clean.sum()
        non_clean = non_clean * (1.0 - dw[0])
        w = state["weights"].at[1:].set(non_clean)

    total_loss = (mean_losses * w).sum()
    new_state = {"moving_average": ma, "weights": w, "dataset_weights": dw}
    # TODO(synk): dataset_dropout path (random per-dataset sample dropping via
    # torch.randperm) not implemented since the default is None.
    return total_loss, mean_losses, new_state


# ----------------------------------------------------------------------------
# Pure-JAX reference (sanity check of the kernel output).
# ----------------------------------------------------------------------------
def _ref_mean_losses_accs(logits, targets):
    logits = logits.astype(jnp.float32)
    targets = targets.astype(jnp.float32)
    logp = jax.nn.log_softmax(logits, axis=-1)
    per_sample = -jnp.sum(targets * logp, axis=-1)       # (B, S)
    mean_losses = per_sample.mean(axis=0)                # (S,)
    acc = (jnp.argmax(logits, -1) == jnp.argmax(targets, -1)).astype(jnp.float32)
    return mean_losses, acc.mean(axis=0)


if __name__ == "__main__":
    key = jax.random.PRNGKey(0)

    def make(B, S, C, k, dtype=jnp.float32):
        k1, k2 = jax.random.split(k)
        lg = jax.random.normal(k1, (B, S, C), jnp.float32).astype(dtype)
        lbl = jax.random.randint(k2, (B, S), 0, C)
        tg = jax.nn.one_hot(lbl, C, dtype=dtype)
        return lg, tg

    k0, k1, k2 = jax.random.split(key, 3)

    # canonical small shape: batch=16, num_datasets (stack)=4, classes=128
    B, S, C = 16, 4, 128
    logits, targets = make(B, S, C, k0)

    state = init_weighted_exp_state(num_datasets=S)
    total_loss, mean_losses, new_state = weighted_exp_loss_forward(
        logits, targets, state, alpha_exp_smooth=0.99,
        include_clean_samples=False, track_metric="loss")
    total_loss = jax.block_until_ready(total_loss)
    mean_losses = jax.block_until_ready(mean_losses)

    # kernel vs pure-JAX reference: loss-only fast path + full acc variant
    ref_ml, ref_ma = _ref_mean_losses_accs(logits, targets)
    ker_ml, _ = _mean_losses_accs(logits, targets)                     # loss-only
    ker_ml2, ker_ma2 = _mean_losses_accs(logits, targets, compute_acc=True)
    np.testing.assert_allclose(np.asarray(ker_ml), np.asarray(ref_ml),
                               rtol=1e-5, atol=1e-5)
    np.testing.assert_allclose(np.asarray(ker_ml2), np.asarray(ref_ml),
                               rtol=1e-5, atol=1e-5)
    np.testing.assert_allclose(np.asarray(ker_ma2), np.asarray(ref_ma),
                               rtol=1e-5, atol=1e-5)

    # ragged batch (cdiv grid + zero padding; loss needs no mask, acc is masked)
    logits_r, targets_r = make(52, S, C, k1)
    ref_ml_r, ref_ma_r = _ref_mean_losses_accs(logits_r, targets_r)
    ker_ml_r, ker_ma_r = _mean_losses_accs(logits_r, targets_r, compute_acc=True)
    np.testing.assert_allclose(np.asarray(ker_ml_r), np.asarray(ref_ml_r),
                               rtol=1e-5, atol=1e-5)
    np.testing.assert_allclose(np.asarray(ker_ma_r), np.asarray(ref_ma_r),
                               rtol=1e-5, atol=1e-5)

    # bf16 inputs (halves HBM traffic; kernel casts per lane-slice to f32)
    logits_bf = logits.astype(jnp.bfloat16)
    targets_bf = targets.astype(jnp.bfloat16)
    ref_ml_bf, ref_ma_bf = _ref_mean_losses_accs(logits_bf, targets_bf)
    ker_ml_bf, ker_ma_bf = _mean_losses_accs(logits_bf, targets_bf,
                                             compute_acc=True)
    np.testing.assert_allclose(np.asarray(ker_ml_bf), np.asarray(ref_ml_bf),
                               rtol=1e-4, atol=1e-4)
    np.testing.assert_allclose(np.asarray(ker_ma_bf), np.asarray(ref_ma_bf),
                               rtol=1e-4, atol=1e-4)

    # non-lane-aligned class count (exercises the C -> multiple-of-128 padding)
    logits_c, targets_c = make(24, 3, 100, k2)
    ref_ml_c, ref_ma_c = _ref_mean_losses_accs(logits_c, targets_c)
    ker_ml_c, ker_ma_c = _mean_losses_accs(logits_c, targets_c, compute_acc=True)
    np.testing.assert_allclose(np.asarray(ker_ml_c), np.asarray(ref_ml_c),
                               rtol=1e-5, atol=1e-5)
    np.testing.assert_allclose(np.asarray(ker_ma_c), np.asarray(ref_ma_c),
                               rtol=1e-5, atol=1e-5)

    assert np.isfinite(float(total_loss))
    print("KERNEL_OK")
</pallas_src>

<mosaic_0001>
module attributes {stable_mosaic.version = 11 : i64} {
  func.func @_loss_kernel(%arg0: i32, %arg1: i32, %arg2: memref<16x512xf32, #tpu.memory_space<vmem>>, %arg3: memref<16x512xf32, #tpu.memory_space<vmem>>, %arg4: memref<8x4xf32, #tpu.memory_space<vmem>>) attributes {dimension_semantics = [#tpu.dimension_semantics<parallel>, #tpu.dimension_semantics<arbitrary>], iteration_bounds = array<i64: 1, 1>, scalar_prefetch = 0 : i64, scratch_operands = 0 : i64, tpu.core_type = #tpu.core_type<tc>, window_params = [{transform_indices = @transform_0, window_bounds = array<i64: 16, 512>}, {transform_indices = @transform_1, window_bounds = array<i64: 16, 512>}, {transform_indices = @transform_2, window_bounds = array<i64: 8, 4>}]} {
    %c0_i32 = arith.constant 0 : i32
    %0 = arith.cmpi eq, %arg1, %c0_i32 : i32
    %1 = arith.extui %0 : i1 to i32
    %c0_i32_0 = arith.constant 0 : i32
    %2 = arith.cmpi ne, %1, %c0_i32_0 : i32
    scf.if %2 {
      %cst_36 = arith.constant 0.000000e+00 : f32
      %87 = vector.broadcast %cst_36 : f32 to vector<8x4xf32>
      %c0_37 = arith.constant 0 : index
      %c0_38 = arith.constant 0 : index
      %88 = vector.load %arg4[%c0_37, %c0_38] : memref<8x4xf32, #tpu.memory_space<vmem>>, vector<8x4xf32>
      tpu.vector_store %arg4[%c0_37, %c0_38], %87 {strides = array<i32>} : memref<8x4xf32, #tpu.memory_space<vmem>>, vector<8x4xf32>,
    } else {
    }
    %c0 = arith.constant 0 : index
    %c0_1 = arith.constant 0 : index
    %3 = vector.load %arg2[%c0, %c0_1] : memref<16x512xf32, #tpu.memory_space<vmem>>, vector<16x128xf32>
    %c0_2 = arith.constant 0 : index
    %c0_3 = arith.constant 0 : index
    %4 = vector.load %arg3[%c0_2, %c0_3] : memref<16x512xf32, #tpu.memory_space<vmem>>, vector<16x128xf32>
    %cst = arith.constant dense<0xFF800000> : vector<16xf32>
    %5 = vector.multi_reduction <maximumf>, %3, %cst [1] : vector<16x128xf32> to vector<16xf32>
    %6 = vector.shape_cast %5 : vector<16xf32> to vector<16x1xf32>
    %7 = vector.broadcast %6 : vector<16x1xf32> to vector<16x128xf32>
    %8 = arith.subf %3, %7 : vector<16x128xf32>
    %9 = math.exp %8 : vector<16x128xf32>
    %cst_4 = arith.constant dense<0.000000e+00> : vector<16xf32>
    %10 = vector.multi_reduction <add>, %9, %cst_4 [1] : vector<16x128xf32> to vector<16xf32>
    %11 = vector.shape_cast %10 : vector<16xf32> to vector<16x1xf32>
    %12 = math.log %11 : vector<16x1xf32>
    %cst_5 = arith.constant dense<0.000000e+00> : vector<16xf32>
    %13 = vector.multi_reduction <add>, %4, %cst_5 [1] : vector<16x128xf32> to vector<16xf32>
    %14 = vector.shape_cast %13 : vector<16xf32> to vector<16x1xf32>
    %15 = arith.mulf %4, %3 : vector<16x128xf32>
    %cst_6 = arith.constant dense<0.000000e+00> : vector<16xf32>
    %16 = vector.multi_reduction <add>, %15, %cst_6 [1] : vector<16x128xf32> to vector<16xf32>
    %17 = vector.shape_cast %16 : vector<16xf32> to vector<16x1xf32>
    %18 = arith.addf %6, %12 : vector<16x1xf32>
    %19 = arith.mulf %18, %14 : vector<16x1xf32>
    %20 = arith.subf %19, %17 : vector<16x1xf32>
    %21 = vector.shape_cast %20 : vector<16x1xf32> to vector<2x8x1xf32>
    %cst_7 = arith.constant dense<0.000000e+00> : vector<8x1xf32>
    %22 = vector.multi_reduction <add>, %21, %cst_7 [0] : vector<2x8x1xf32> to vector<8x1xf32>
    %c0_8 = arith.constant 0 : index
    %c128 = arith.constant 128 : index
    %23 = vector.load %arg2[%c0_8, %c128] : memref<16x512xf32, #tpu.memory_space<vmem>>, vector<16x128xf32>
    %c0_9 = arith.constant 0 : index
    %c128_10 = arith.constant 128 : index
    %24 = vector.load %arg3[%c0_9, %c128_10] : memref<16x512xf32, #tpu.memory_space<vmem>>, vector<16x128xf32>
    %cst_11 = arith.constant dense<0xFF800000> : vector<16xf32>
    %25 = vector.multi_reduction <maximumf>, %23, %cst_11 [1] : vector<16x128xf32> to vector<16xf32>
    %26 = vector.shape_cast %25 : vector<16xf32> to vector<16x1xf32>
    %27 = vector.broadcast %26 : vector<16x1xf32> to vector<16x128xf32>
    %28 = arith.subf %23, %27 : vector<16x128xf32>
    %29 = math.exp %28 : vector<16x128xf32>
    %cst_12 = arith.constant dense<0.000000e+00> : vector<16xf32>
    %30 = vector.multi_reduction <add>, %29, %cst_12 [1] : vector<16x128xf32> to vector<16xf32>
    %31 = vector.shape_cast %30 : vector<16xf32> to vector<16x1xf32>
    %32 = math.log %31 : vector<16x1xf32>
    %cst_13 = arith.constant dense<0.000000e+00> : vector<16xf32>
    %33 = vector.multi_reduction <add>, %24, %cst_13 [1] : vector<16x128xf32> to vector<16xf32>
    %34 = vector.shape_cast %33 : vector<16xf32> to vector<16x1xf32>
    %35 = arith.mulf %24, %23 : vector<16x128xf32>
    %cst_14 = arith.constant dense<0.000000e+00> : vector<16xf32>
    %36 = vector.multi_reduction <add>, %35, %cst_14 [1] : vector<16x128xf32> to vector<16xf32>
    %37 = vector.shape_cast %36 : vector<16xf32> to vector<16x1xf32>
    %38 = arith.addf %26, %32 : vector<16x1xf32>
    %39 = arith.mulf %38, %34 : vector<16x1xf32>
    %40 = arith.subf %39, %37 : vector<16x1xf32>
    %41 = vector.shape_cast %40 : vector<16x1xf32> to vector<2x8x1xf32>
    %cst_15 = arith.constant dense<0.000000e+00> : vector<8x1xf32>
    %42 = vector.multi_reduction <add>, %41, %cst_15 [0] : vector<2x8x1xf32> to vector<8x1xf32>
    %c0_16 = arith.constant 0 : index
    %c256 = arith.constant 256 : index
    %43 = vector.load %arg2[%c0_16, %c256] : memref<16x512xf32, #tpu.memory_space<vmem>>, vector<16x128xf32>
    %c0_17 = arith.constant 0 : index
    %c256_18 = arith.constant 256 : index
    %44 = vector.load %arg3[%c0_17, %c256_18] : memref<16x512xf32, #tpu.memory_space<vmem>>, vector<16x128xf32>
    %cst_19 = arith.constant dense<0xFF800000> : vector<16xf32>
    %45 = vector.multi_reduction <maximumf>, %43, %cst_19 [1] : vector<16x128xf32> to vector<16xf32>
    %46 = vector.shape_cast %45 : vector<16xf32> to vector<16x1xf32>
    %47 = vector.broadcast %46 : vector<16x1xf32> to vector<16x128xf32>
    %48 = arith.subf %43, %47 : vector<16x128xf32>
    %49 = math.exp %48 : vector<16x128xf32>
    %cst_20 = arith.constant dense<0.000000e+00> : vector<16xf32>
    %50 = vector.multi_reduction <add>, %49, %cst_20 [1] : vector<16x128xf32> to vector<16xf32>
    %51 = vector.shape_cast %50 : vector<16xf32> to vector<16x1xf32>
    %52 = math.log %51 : vector<16x1xf32>
    %cst_21 = arith.constant dense<0.000000e+00> : vector<16xf32>
    %53 = vector.multi_reduction <add>, %44, %cst_21 [1] : vector<16x128xf32> to vector<16xf32>
    %54 = vector.shape_cast %53 : vector<16xf32> to vector<16x1xf32>
    %55 = arith.mulf %44, %43 : vector<16x128xf32>
    %cst_22 = arith.constant dense<0.000000e+00> : vector<16xf32>
    %56 = vector.multi_reduction <add>, %55, %cst_22 [1] : vector<16x128xf32> to vector<16xf32>
    %57 = vector.shape_cast %56 : vector<16xf32> to vector<16x1xf32>
    %58 = arith.addf %46, %52 : vector<16x1xf32>
    %59 = arith.mulf %58, %54 : vector<16x1xf32>
    %60 = arith.subf %59, %57 : vector<16x1xf32>
    %61 = vector.shape_cast %60 : vector<16x1xf32> to vector<2x8x1xf32>
    %cst_23 = arith.constant dense<0.000000e+00> : vector<8x1xf32>
    %62 = vector.multi_reduction <add>, %61, %cst_23 [0] : vector<2x8x1xf32> to vector<8x1xf32>
    %c0_24 = arith.constant 0 : index
    %c384 = arith.constant 384 : index
    %63 = vector.load %arg2[%c0_24, %c384] : memref<16x512xf32, #tpu.memory_space<vmem>>, vector<16x128xf32>
    %c0_25 = arith.constant 0 : index
    %c384_26 = arith.constant 384 : index
    %64 = vector.load %arg3[%c0_25, %c384_26] : memref<16x512xf32, #tpu.memory_space<vmem>>, vector<16x128xf32>
    %cst_27 = arith.constant dense<0xFF800000> : vector<16xf32>
    %65 = vector.multi_reduction <maximumf>, %63, %cst_27 [1] : vector<16x128xf32> to vector<16xf32>
    %66 = vector.shape_cast %65 : vector<16xf32> to vector<16x1xf32>
    %67 = vector.broadcast %66 : vector<16x1xf32> to vector<16x128xf32>
    %68 = arith.subf %63, %67 : vector<16x128xf32>
    %69 = math.exp %68 : vector<16x128xf32>
    %cst_28 = arith.constant dense<0.000000e+00> : vector<16xf32>
    %70 = vector.multi_reduction <add>, %69, %cst_28 [1] : vector<16x128xf32> to vector<16xf32>
    %71 = vector.shape_cast %70 : vector<16xf32> to vector<16x1xf32>
    %72 = math.log %71 : vector<16x1xf32>
    %cst_29 = arith.constant dense<0.000000e+00> : vector<16xf32>
    %73 = vector.multi_reduction <add>, %64, %cst_29 [1] : vector<16x128xf32> to vector<16xf32>
    %74 = vector.shape_cast %73 : vector<16xf32> to vector<16x1xf32>
    %75 = arith.mulf %64, %63 : vector<16x128xf32>
    %cst_30 = arith.constant dense<0.000000e+00> : vector<16xf32>
    %76 = vector.multi_reduction <add>, %75, %cst_30 [1] : vector<16x128xf32> to vector<16xf32>
    %77 = vector.shape_cast %76 : vector<16xf32> to vector<16x1xf32>
    %78 = arith.addf %66, %72 : vector<16x1xf32>
    %79 = arith.mulf %78, %74 : vector<16x1xf32>
    %80 = arith.subf %79, %77 : vector<16x1xf32>
    %81 = vector.shape_cast %80 : vector<16x1xf32> to vector<2x8x1xf32>
    %cst_31 = arith.constant dense<0.000000e+00> : vector<8x1xf32>
    %82 = vector.multi_reduction <add>, %81, %cst_31 [0] : vector<2x8x1xf32> to vector<8x1xf32>
    %c0_32 = arith.constant 0 : index
    %c0_33 = arith.constant 0 : index
    %83 = vector.load %arg4[%c0_32, %c0_33] : memref<8x4xf32, #tpu.memory_space<vmem>>, vector<8x4xf32>
    %84 = tpu.concatenate %22, %42, %62, %82 in 1 : vector<8x1xf32>, vector<8x1xf32>, vector<8x1xf32>, vector<8x1xf32> -> vector<8x4xf32>
    %85 = arith.addf %83, %84 : vector<8x4xf32>
    %c0_34 = arith.constant 0 : index
    %c0_35 = arith.constant 0 : index
    %86 = vector.load %arg4[%c0_34, %c0_35] : memref<8x4xf32, #tpu.memory_space<vmem>>, vector<8x4xf32>
    tpu.vector_store %arg4[%c0_34, %c0_35], %85 {strides = array<i32>} : memref<8x4xf32, #tpu.memory_space<vmem>>, vector<8x4xf32>,
    return
  }
  func.func @transform_0(%arg0: i32, %arg1: i32) -> (i32, i32) {
    %c1_i32 = arith.constant 1 : i32
    %0 = arith.muli %arg0, %c1_i32 : i32
    %1 = arith.addi %0, %arg1 : i32
    %c0_i32 = arith.constant 0 : i32
    %c0_i32_0 = arith.constant 0 : i32
    return %1, %c0_i32 : i32, i32
  }
  func.func @transform_1(%arg0: i32, %arg1: i32) -> (i32, i32) {
    %c1_i32 = arith.constant 1 : i32
    %0 = arith.muli %arg0, %c1_i32 : i32
    %1 = arith.addi %0, %arg1 : i32
    %c0_i32 = arith.constant 0 : i32
    %c0_i32_0 = arith.constant 0 : i32
    return %1, %c0_i32 : i32, i32
  }
  func.func @transform_2(%arg0: i32, %arg1: i32) -> (i32, i32) {
    %c0_i32 = arith.constant 0 : i32
    %c0_i32_0 = arith.constant 0 : i32
    return %arg0, %c0_i32 : i32, i32
  }
}

</mosaic_0001>

<bundles_post_ra>
// kernel: _mean_losses_accs.1
= control target key start
LH: loop header
LB: loop body
LE: loop exit
PB: predicated region body
PF: predicated region fallthrough
CT: control target
= control target key end

     0   :  { %vm65_vm0 = vcmask 31744   ;;  %v282_v56 = vmov 0.0   ;;  %vm224_vm1 = vcmask 7168   ;;  %vm226_vm2 = vcmask 15360   ;;  %s437_s0 = inlined_call_operand.vmem [shape: f32[16,512], index: 0, kind: input, shape index: {}]   ;;  %s438_s1 = inlined_call_operand.vmem [shape: f32[16,512], index: 1, kind: input, shape index: {}]   ;;  %s439_s2 = inlined_call_operand.vmem [shape: f32[8,4], index: 2, kind: output, shape index: {}]  }
   0x1   :  { %v301_v0 = vld [vmem:[%s437_s0] sm:$0xff]  ;;  %v306_v1 = vld [vmem:[%s437_s0 + $0x8] sm:$0xff]  ;;  %v325_v4 = vld [vmem:[%s437_s0 + $0x10] sm:$0xff]  ;;  %66 = vst.msk [vmem:[%s439_s2] sm:$0xff] %vm65_vm0, %v282_v56  ;;  %vm228_vm3 = vcmask 23552  }
   0x2   :  { %71 = vmax.xlane.f32.xlu0 %v301_v0  ;;  %110 = vmax.xlane.f32.xlu1 %v306_v1  ;;  %v313_v2 = vld [vmem:[%s437_s0 + $0x20] sm:$0xff]  ;;  %v318_v3 = vld [vmem:[%s437_s0 + $0x28] sm:$0xff]  ;;  %v330_v5 = vld [vmem:[%s437_s0 + $0x30] sm:$0xff] }
   0x3   :  { %v337_v6 = vld [vmem:[%s437_s0 + $0x18] sm:$0xff]  ;;  %v69_v8 = vld [vmem:[%s438_s1] sm:$0xff]  ;;  %v108_v10 = vld [vmem:[%s438_s1 + $0x8] sm:$0xff] }
   0x4   :  { %v342_v7 = vld [vmem:[%s437_s0 + $0x38] sm:$0xff]  ;;  %v70_v9 = vld [vmem:[%s438_s1 + $0x20] sm:$0xff]  ;;  %v109_v11 = vld [vmem:[%s438_s1 + $0x28] sm:$0xff]  ;;  %v93_v45 = vmul.f32 %v69_v8, %v301_v0  ;;  %v132_v48 = vmul.f32 %v108_v10, %v306_v1 }
   0x5   :  { %v361_v12 = vld [vmem:[%s438_s1 + $0x10] sm:$0xff]  ;;  %v94_v47 = vmul.f32 %v70_v9, %v313_v2  ;;  %v133_v49 = vmul.f32 %v109_v11, %v318_v3  ;;  %v186_v50 = vld [vmem:[%s438_s1 + $0x18] sm:$0xff] }
   0x6   :  { %73 = vmax.xlane.f32.xlu0 %v313_v2  ;;  %112 = vmax.xlane.f32.xlu1 %v318_v3  ;;  %v367_v13 = vld [vmem:[%s438_s1 + $0x30] sm:$0xff]  ;;  %v171_v51 = vmul.f32 %v361_v12, %v325_v4  ;;  %v187_v52 = vld [vmem:[%s438_s1 + $0x38] sm:$0xff]  ;;  %v210_v54 = vmul.f32 %v186_v50, %v337_v6 }
   0x7   :  { %v172_v53 = vmul.f32 %v367_v13, %v330_v5  ;;  %v211_v55 = vmul.f32 %v187_v52, %v342_v7 }
   0xa   :  { %149 = vmax.xlane.f32.xlu0 %v325_v4  ;;  %151 = vmax.xlane.f32.xlu1 %v330_v5 }
   0xe   :  { %188 = vmax.xlane.f32.xlu0 %v337_v6  ;;  %190 = vmax.xlane.f32.xlu1 %v342_v7 }
  0x12   :  { %89 = vadd.xlane.f32.xlu0 %v69_v8  ;;  %91 = vadd.xlane.f32.xlu1 %v70_v9 }
  0x16   :  { %128 = vadd.xlane.f32.xlu0 %v108_v10  ;;  %130 = vadd.xlane.f32.xlu1 %v109_v11 }
  0x1a   :  { %167 = vadd.xlane.f32.xlu0 %v361_v12  ;;  %169 = vadd.xlane.f32.xlu1 %v367_v13 }
  0x8f   :  { %v370_v14 = vpop.xlane.xlu0 %71  ;;  %v372_v15 = vpop.xlane.xlu1 %110 }
  0x90   :  { %v75_v16 = vsub.f32 %v301_v0, %v370_v14  ;;  %v114_v17 = vsub.f32 %v306_v1, %v372_v15 }
  0x92   :  { %v77_v18 = vmul.f32 1.442695, %v75_v16  ;;  %v116_v19 = vmul.f32 1.442695, %v114_v17 }
  0x93   :  { %v378_v20 = vpop.xlane.xlu0 %73  ;;  %v380_v21 = vpop.xlane.xlu1 %112 }
  0x94   :  { %250 = vpow2.f32 %v77_v18  ;;  %v76_v22 = vsub.f32 %v313_v2, %v378_v20  ;;  %v115_v23 = vsub.f32 %v318_v3, %v380_v21 }
  0x95   :  { %252 = vpow2.f32 %v116_v19 }
  0x96   :  { %v79_v24 = vmul.f32 1.442695, %v76_v22  ;;  %v118_v25 = vmul.f32 1.442695, %v115_v23 }
  0x97   :  { %v386_v26 = vpop.xlane.xlu0 %149  ;;  %v388_v27 = vpop.xlane.xlu1 %151 }
  0x98   :  { %254 = vpow2.f32 %v79_v24  ;;  %v153_v28 = vsub.f32 %v325_v4, %v386_v26  ;;  %v154_v29 = vsub.f32 %v330_v5, %v388_v27 }
  0x99   :  { %256 = vpow2.f32 %v118_v25 }
  0x9a   :  { %v155_v30 = vmul.f32 1.442695, %v153_v28  ;;  %v157_v31 = vmul.f32 1.442695, %v154_v29 }
  0x9b   :  { %v394_v32 = vpop.xlane.xlu0 %188  ;;  %v396_v33 = vpop.xlane.xlu1 %190 }
  0x9c   :  { %258 = vpow2.f32 %v155_v30  ;;  %v192_v34 = vsub.f32 %v337_v6, %v394_v32  ;;  %v193_v35 = vsub.f32 %v342_v7, %v396_v33 }
  0x9d   :  { %260 = vpow2.f32 %v157_v31 }
  0x9e   :  { %v251_v36 = vpop.eup %250  ;;  %v194_v37 = vmul.f32 1.442695, %v192_v34  ;;  %v196_v38 = vmul.f32 1.442695, %v193_v35 }
  0x9f   :  { %81 = vadd.xlane.f32.xlu0 %v251_v36  ;;  %v253_v39 = vpop.eup %252  ;;  %v90_v57 = vpop.xlane.xlu0 %89 }
  0xa0   :  { %262 = vpow2.f32 %v194_v37  ;;  %v92_v58 = vpop.xlane.xlu1 %91 }
  0xa1   :  { %264 = vpow2.f32 %v196_v38 }
  0xa2   :  { %v255_v40 = vpop.eup %254 }
  0xa3   :  { %120 = vadd.xlane.f32.xlu0 %v253_v39  ;;  %83 = vadd.xlane.f32.xlu1 %v255_v40  ;;  %v257_v41 = vpop.eup %256  ;;  %v129_v59 = vpop.xlane.xlu0 %128 }
  0xa4   :  { %v131_v60 = vpop.xlane.xlu1 %130 }
  0xa6   :  { %v259_v42 = vpop.eup %258 }
  0xa7   :  { %122 = vadd.xlane.f32.xlu1 %v257_v41  ;;  %159 = vadd.xlane.f32.xlu0 %v259_v42  ;;  %v261_v43 = vpop.eup %260  ;;  %v168_v61 = vpop.xlane.xlu0 %167 }
  0xa8   :  { %v170_v62 = vpop.xlane.xlu1 %169 }
  0xaa   :  { %v263_v44 = vpop.eup %262 }
  0xab   :  { %161 = vadd.xlane.f32.xlu1 %v261_v43  ;;  %198 = vadd.xlane.f32.xlu0 %v263_v44  ;;  %v265_v46 = vpop.eup %264 }
  0xaf   :  { %200 = vadd.xlane.f32.xlu1 %v265_v46  ;;  %95 = vadd.xlane.f32.xlu0 %v93_v45 }
  0xb3   :  { %97 = vadd.xlane.f32.xlu1 %v94_v47  ;;  %134 = vadd.xlane.f32.xlu0 %v132_v48 }
  0xb7   :  { %136 = vadd.xlane.f32.xlu1 %v133_v49  ;;  %206 = vadd.xlane.f32.xlu0 %v186_v50 }
  0xbb   :  { %208 = vadd.xlane.f32.xlu1 %v187_v52  ;;  %173 = vadd.xlane.f32.xlu0 %v171_v51 }
  0xbf   :  { %175 = vadd.xlane.f32.xlu1 %v172_v53  ;;  %212 = vadd.xlane.f32.xlu0 %v210_v54 }
  0xc3   :  { %214 = vadd.xlane.f32.xlu1 %v211_v55 }
 0x12c   :  { %v82_v63 = vpop.xlane.xlu0 %81 }
 0x12d   :  { %266 = vlog2.f32 %v82_v63 }
 0x130   :  { %v84_v0 = vpop.xlane.xlu1 %83  ;;  %v121_v1 = vpop.xlane.xlu0 %120 }
 0x131   :  { %268 = vlog2.f32 %v84_v0 }
 0x132   :  { %270 = vlog2.f32 %v121_v1 }
 0x134   :  { %v123_v2 = vpop.xlane.xlu1 %122  ;;  %v160_v3 = vpop.xlane.xlu0 %159 }
 0x135   :  { %272 = vlog2.f32 %v123_v2 }
 0x136   :  { %274 = vlog2.f32 %v160_v3 }
 0x137   :  { %v267_v6 = vpop.eup %266 }
 0x138   :  { %v162_v4 = vpop.xlane.xlu1 %161  ;;  %v199_v5 = vpop.xlane.xlu0 %198  ;;  %v86_v22 = vmul.f32 0.6931472, %v267_v6 }
 0x139   :  { %276 = vlog2.f32 %v162_v4 }
 0x13a   :  { %278 = vlog2.f32 %v199_v5  ;;  %v99_v36 = vadd.f32 %v86_v22, %v370_v14 }
 0x13b   :  { %v269_v9 = vpop.eup %268 }
 0x13c   :  { %v201_v7 = vpop.xlane.xlu1 %200  ;;  %v96_v8 = vpop.xlane.xlu0 %95  ;;  %v88_v18 = vmul.f32 0.6931472, %v269_v9  ;;  %v101_v46 = vmul.f32 %v99_v36, %v90_v57 }
 0x13d   :  { %280 = vlog2.f32 %v201_v7  ;;  %v271_v10 = vpop.eup %270 }
 0x13e   :  { %v125_v19 = vmul.f32 0.6931472, %v271_v10  ;;  %v100_v34 = vadd.f32 %v88_v18, %v378_v20  ;;  %v103_v54 = vsub.f32 %v101_v46, %v96_v8 }
 0x13f   :  { %v273_v11 = vpop.eup %272 }
 0x140   :  { %v127_v12 = vmul.f32 0.6931472, %v273_v11  ;;  %v98_v13 = vpop.xlane.xlu1 %97  ;;  %v135_v16 = vpop.xlane.xlu0 %134  ;;  %v138_v35 = vadd.f32 %v125_v19, %v372_v15  ;;  %v102_v44 = vmul.f32 %v100_v34, %v92_v58 }
 0x141   :  { %v275_v17 = vpop.eup %274 }
 0x142   :  { %v139_v24 = vadd.f32 %v127_v12, %v380_v21  ;;  %v164_v28 = vmul.f32 0.6931472, %v275_v17  ;;  %v140_v45 = vmul.f32 %v138_v35, %v129_v59  ;;  %v104_v50 = vsub.f32 %v102_v44, %v98_v13 }
 0x143   :  { %v277_v23 = vpop.eup %276 }
 0x144   :  { %v279_v25 = vpop.eup %278  ;;  %v166_v29 = vmul.f32 0.6931472, %v277_v23  ;;  %v137_v30 = vpop.xlane.xlu1 %136  ;;  %v141_v39 = vmul.f32 %v139_v24, %v131_v60  ;;  %v177_v21 = vadd.f32 %v164_v28, %v386_v26  ;;  %v142_v51 = vsub.f32 %v140_v45, %v135_v16 }
 0x145   :  { %v207_v31 = vpop.xlane.xlu0 %206  ;;  %v203_v38 = vmul.f32 0.6931472, %v279_v25  ;;  %v105_v59 = vadd.f32 %v104_v50, %v103_v54 }
 0x146   :  { %v178_v40 = vadd.f32 %v166_v29, %v388_v27  ;;  %v143_v47 = vsub.f32 %v141_v39, %v137_v30  ;;  %v179_v14 = vmul.f32 %v177_v21, %v168_v61  ;;  %v223_v61 = vld [vmem:[%s439_s2] sm:$0xff] }
 0x147   :  { %v281_v37 = vpop.eup %280  ;;  %v216_v20 = vadd.f32 %v203_v38, %v394_v32 }
 0x148   :  { %v205_v41 = vmul.f32 0.6931472, %v281_v37  ;;  %v209_v42 = vpop.xlane.xlu1 %208  ;;  %v180_v48 = vmul.f32 %v178_v40, %v170_v62  ;;  %v144_v55 = vadd.f32 %v143_v47, %v142_v51 }
 0x149   :  { %v174_v43 = vpop.xlane.xlu0 %173  ;;  %v218_v26 = vmul.f32 %v216_v20, %v207_v31 }
 0x14a   :  { %v217_v15 = vadd.f32 %v205_v41, %v396_v33  ;;  %v181_v27 = vsub.f32 %v179_v14, %v174_v43  ;;  %v225_v33 = vsel %vm224_vm1, %v105_v59, %v144_v55 }
 0x14c   :  { %v176_v49 = vpop.xlane.xlu1 %175  ;;  %v219_v56 = vmul.f32 %v217_v15, %v209_v42 }
 0x14d   :  { %v182_v52 = vsub.f32 %v180_v48, %v176_v49  ;;  %v213_v53 = vpop.xlane.xlu0 %212 }
 0x14e   :  { %v220_v32 = vsub.f32 %v218_v26, %v213_v53 }
 0x14f   :  { %v183_v58 = vadd.f32 %v182_v52, %v181_v27 }
 0x150   :  { %v215_v57 = vpop.xlane.xlu1 %214 }
 0x151   :  { %v221_v60 = vsub.f32 %v219_v56, %v215_v57  ;;  %v227_v63 = vsel %vm226_vm2, %v225_v33, %v183_v58 }
 0x153   :  { %v222_v62 = vadd.f32 %v221_v60, %v220_v32 }
 0x155   :  { %v229_v0 = vsel %vm228_vm3, %v227_v63, %v222_v62 }
 0x156   :  { %v230_v1 = vadd.f32 %v229_v0, %v223_v61 }
 0x158   :  { %232 = vst.msk [vmem:[%s439_s2] sm:$0xff] %vm65_vm0, %v230_v1 }

</bundles_post_ra>
